<compile_context>
chip_gen: v6e
topology: v6e:2x2x1
jax: 0.10.0
libtpu: 0.0.40
codegen_flags: <defaults>
</compile_context>

<pallas_src>
import functools
import math

import jax
import jax.numpy as jnp
from jax import lax
from jax.experimental import pallas as pl
from jax.experimental.pallas import tpu as pltpu

OUT_PAD = 128  # lane-dense padded classifier width (real logits are [:, :2])


def _mha_classifier_kernel(
    x_ref,       # (1, S, Dm)
    wqkv_ref,    # (3, H, Dm, hd)   fused (outer proj @ in_proj), pre-transposed, head-split
    bqkv_ref,    # (3, H, 1, hd)
    woc_ref,     # (H, hd, OUT_PAD) fused (classifier @ out_proj), pre-transposed, head-split
    boc_ref,     # (1, OUT_PAD)
    out_ref,     # (1, S, OUT_PAD)
    *, num_heads, head_dim,
):
    H = num_heads
    x = x_ref[0]                                   # (S, Dm)
    S = x.shape[0]
    xh = jnp.broadcast_to(x, (H,) + x.shape)       # (H, S, Dm) leading-dim broadcast (cheap)

    def proj(i):
        # Batched per-head projection: (H,S,Dm) @ (H,Dm,hd) -> (H,S,hd)
        y = jnp.einsum("hsd,hde->hse", xh, wqkv_ref[i],
                       preferred_element_type=jnp.float32)
        return y + bqkv_ref[i]                     # bias (H,1,hd) broadcasts over S

    q = proj(0)
    k = proj(1)
    v = proj(2)

    scale = 1.0 / math.sqrt(head_dim)
    # Scores for all heads in one batched matmul: (H, S, S)
    s = jnp.einsum("hqd,hkd->hqk", q, k, preferred_element_type=jnp.float32) * scale

    # Causal mask built once as a finite additive bias (broadcast over heads).
    row = lax.broadcasted_iota(jnp.int32, (S, S), 0)
    col = lax.broadcasted_iota(jnp.int32, (S, S), 1)
    mask_bias = jnp.where(col > row, jnp.float32(-1e9), jnp.float32(0.0))
    s = s + mask_bias

    # Softmax in float32 (keep f32 elementwise path; important on v5e).
    m = jnp.max(s, axis=-1, keepdims=True)
    p = jnp.exp(s - m)
    p = p / jnp.sum(p, axis=-1, keepdims=True)

    # Context for all heads: (H, S, hd)
    ctx = jnp.einsum("hqk,hkd->hqd", p.astype(v.dtype), v,
                     preferred_element_type=jnp.float32)

    # Fused out_proj + classifier, accumulated over heads (no concat needed).
    logits_h = jnp.einsum("hqd,hdo->hqo", ctx, woc_ref[...],
                          preferred_element_type=jnp.float32)   # (H, S, OUT_PAD)
    logits = jnp.sum(logits_h, axis=0) + boc_ref[...]            # (S, OUT_PAD)
    out_ref[0] = logits.astype(out_ref.dtype)


def _prepare_weights(params, num_heads, compute_dtype):
    """Fuse, pre-transpose, head-split and pack the weights (done once, outside the kernel)."""
    E, Dm = params["wqp"].shape
    hd = E // num_heads

    def fuse_in(w_outer, b_outer, w_in, b_in):
        # (x @ w_outer.T + b_outer) @ w_in.T + b_in == x @ (w_in @ w_outer).T + (b_outer @ w_in.T + b_in)
        w = w_in @ w_outer                       # (E, Dm)
        b = b_outer[0] @ w_in.T + b_in[0]        # (E,)
        wt = w.T                                 # (Dm, E), pre-transposed
        w_heads = wt.reshape(Dm, num_heads, hd).transpose(1, 0, 2)   # (H, Dm, hd)
        b_heads = b.reshape(num_heads, 1, hd)                        # (H, 1, hd)
        return w_heads, b_heads

    wq, bq = fuse_in(params["wqp"], params["bqp"], params["wqi"], params["bqi"])
    wk, bk = fuse_in(params["wkp"], params["bkp"], params["wki"], params["bki"])
    wv, bv = fuse_in(params["wvp"], params["bvp"], params["wvi"], params["bvi"])

    wqkv = jnp.stack([wq, wk, wv], axis=0)       # (3, H, Dm, hd)
    bqkv = jnp.stack([bq, bk, bv], axis=0)       # (3, H, 1, hd)

    # out_proj fused with classifier: attn @ (wc @ wo).T + (bo @ wc.T + bc)
    w_oc = params["wc"] @ params["wo"]           # (2, E)
    b_oc = params["bo"][0] @ params["wc"].T + params["bc"][0]   # (2,)
    n_out = w_oc.shape[0]
    woc_pad = jnp.zeros((E, OUT_PAD), jnp.float32).at[:, :n_out].set(w_oc.T)
    woc_heads = woc_pad.reshape(num_heads, hd, OUT_PAD)          # (H, hd, OUT_PAD)
    boc_pad = jnp.zeros((1, OUT_PAD), jnp.float32).at[0, :n_out].set(b_oc)

    wqkv = wqkv.astype(compute_dtype)
    bqkv = bqkv.astype(jnp.float32)              # bias added after f32 accumulation
    woc_heads = woc_heads.astype(compute_dtype)
    return wqkv, bqkv, woc_heads, boc_pad, n_out


def transformer_linear_classifier(x, params, num_heads, compute_dtype=jnp.float32):
    """x: (seq_len, bsz, model_dim) float32 -> (seq_len, bsz, 2) float32.

    compute_dtype: matmul-operand dtype.  Use jnp.bfloat16 on v6e/v7x for MXU
    throughput (accumulation/softmax stay f32); keep float32 for exactness / v5e.
    """
    S, B, Dm = x.shape
    E = params["wqp"].shape[0]
    head_dim = E // num_heads

    xb = jnp.transpose(x, (1, 0, 2)).astype(compute_dtype)   # (B, S, Dm) batch-major

    wqkv, bqkv, woc, boc, n_out = _prepare_weights(params, num_heads, compute_dtype)

    kernel = functools.partial(
        _mha_classifier_kernel, num_heads=num_heads, head_dim=head_dim
    )

    itemsize = jnp.dtype(jnp.float32).itemsize
    flops = B * (
        3 * 2 * S * Dm * E          # fused QKV projections
        + 2 * 2 * S * S * E         # scores + context
        + 2 * S * E * OUT_PAD       # fused out_proj/classifier
    )
    bytes_accessed = (
        xb.size * xb.dtype.itemsize
        + wqkv.size * wqkv.dtype.itemsize
        + bqkv.size * bqkv.dtype.itemsize
        + woc.size * woc.dtype.itemsize
        + boc.size * boc.dtype.itemsize
        + B * S * OUT_PAD * itemsize
    )
    cost = pl.CostEstimate(
        flops=flops,
        transcendentals=B * num_heads * S * S,
        bytes_accessed=bytes_accessed,
    )

    out = pl.pallas_call(
        kernel,
        out_shape=jax.ShapeDtypeStruct((B, S, OUT_PAD), jnp.float32),
        grid=(B,),
        in_specs=[
            pl.BlockSpec((1, S, Dm), lambda b: (b, 0, 0)),
            pl.BlockSpec(wqkv.shape, lambda b: (0, 0, 0, 0)),
            pl.BlockSpec(bqkv.shape, lambda b: (0, 0, 0, 0)),
            pl.BlockSpec(woc.shape, lambda b: (0, 0, 0)),
            pl.BlockSpec(boc.shape, lambda b: (0, 0)),
        ],
        out_specs=pl.BlockSpec((1, S, OUT_PAD), lambda b: (b, 0, 0)),
        compiler_params=pltpu.CompilerParams(dimension_semantics=("parallel",)),
        cost_estimate=cost,
    )(xb, wqkv, bqkv, woc, boc)

    logits = out[:, :, :n_out]                      # drop lane padding
    return jnp.transpose(logits, (1, 0, 2))         # back to (S, B, 2)


def init_params(key, model_dim, embed_dim):
    """Deterministic synthetic parameters matching the PyTorch module shapes."""
    ks = jax.random.split(key, 16)
    s = 0.1
    return {
        # outer query/key/value Linear(model_dim, embed_dim)
        "wqp": jax.random.normal(ks[0], (embed_dim, model_dim), jnp.float32) * s,
        "bqp": jax.random.normal(ks[1], (1, embed_dim), jnp.float32) * s,
        "wkp": jax.random.normal(ks[2], (embed_dim, model_dim), jnp.float32) * s,
        "bkp": jax.random.normal(ks[3], (1, embed_dim), jnp.float32) * s,
        "wvp": jax.random.normal(ks[4], (embed_dim, model_dim), jnp.float32) * s,
        "bvp": jax.random.normal(ks[5], (1, embed_dim), jnp.float32) * s,
        # nn.MultiheadAttention in_proj_weight (3E, E) split into q/k/v blocks
        "wqi": jax.random.normal(ks[6], (embed_dim, embed_dim), jnp.float32) * s,
        "bqi": jax.random.normal(ks[7], (1, embed_dim), jnp.float32) * s,
        "wki": jax.random.normal(ks[8], (embed_dim, embed_dim), jnp.float32) * s,
        "bki": jax.random.normal(ks[9], (1, embed_dim), jnp.float32) * s,
        "wvi": jax.random.normal(ks[10], (embed_dim, embed_dim), jnp.float32) * s,
        "bvi": jax.random.normal(ks[11], (1, embed_dim), jnp.float32) * s,
        # nn.MultiheadAttention out_proj
        "wo": jax.random.normal(ks[12], (embed_dim, embed_dim), jnp.float32) * s,
        "bo": jax.random.normal(ks[13], (1, embed_dim), jnp.float32) * s,
        # classifier Linear(embed_dim, 2)
        "wc": jax.random.normal(ks[14], (2, embed_dim), jnp.float32) * s,
        "bc": jax.random.normal(ks[15], (1, 2), jnp.float32) * s,
    }


def reference_forward(x, p, num_heads):
    """Pure-JAX reference replicating PyTorch forward semantics (unfused)."""
    S, B, Dm = x.shape
    E = p["wqp"].shape[0]
    hd = E // num_heads

    Q = x @ p["wqp"].T + p["bqp"][0]
    K = x @ p["wkp"].T + p["bkp"][0]
    V = x @ p["wvp"].T + p["bvp"][0]

    q = Q @ p["wqi"].T + p["bqi"][0]
    k = K @ p["wki"].T + p["bki"][0]
    v = V @ p["wvi"].T + p["bvi"][0]

    def split(t):  # (S, B, E) -> (B, H, S, hd)
        return jnp.transpose(t.reshape(S, B, num_heads, hd), (1, 2, 0, 3))

    qh, kh, vh = split(q), split(k), split(v)
    scores = jnp.einsum("bhqd,bhkd->bhqk", qh, kh) / math.sqrt(hd)
    row = jnp.arange(S)[:, None]
    col = jnp.arange(S)[None, :]
    scores = jnp.where(col > row, -jnp.inf, scores)
    probs = jax.nn.softmax(scores, axis=-1)
    ctx = jnp.einsum("bhqk,bhkd->bhqd", probs, vh)
    ctx = jnp.transpose(ctx, (2, 0, 1, 3)).reshape(S, B, E)
    o = ctx @ p["wo"].T + p["bo"][0]
    return o @ p["wc"].T + p["bc"][0]


if __name__ == "__main__":
    seq_len, bsz, model_dim, embed_dim, num_heads = 8, 2, 32, 32, 4

    key = jax.random.PRNGKey(0)
    kx, kp = jax.random.split(key)
    x = jax.random.normal(kx, (seq_len, bsz, model_dim), jnp.float32)
    params = init_params(kp, model_dim, embed_dim)

    # float32 compute keeps exact parity with the f32 reference; pass
    # compute_dtype=jnp.bfloat16 on v6e/v7x for MXU throughput at scale.
    out = transformer_linear_classifier(x, params, num_heads)
    out = jax.block_until_ready(out)

    ref = reference_forward(x, params, num_heads)
    assert out.shape == (seq_len, bsz, 2), out.shape
    assert jnp.allclose(out, ref, atol=1e-4, rtol=1e-4), (
        "mismatch vs reference: max abs diff "
        + str(float(jnp.max(jnp.abs(out - ref))))
    )
    print("KERNEL_OK")
</pallas_src>

<mosaic_0001>
module attributes {stable_mosaic.version = 11 : i64} {
  func.func @_mha_classifier_kernel(%arg0: i32, %arg1: memref<1x8x32xf32, #tpu.memory_space<vmem>>, %arg2: memref<3x4x32x8xf32, #tpu.memory_space<vmem>>, %arg3: memref<3x4x1x8xf32, #tpu.memory_space<vmem>>, %arg4: memref<4x8x128xf32, #tpu.memory_space<vmem>>, %arg5: memref<1x128xf32, #tpu.memory_space<vmem>>, %arg6: memref<1x8x128xf32, #tpu.memory_space<vmem>>) attributes {dimension_semantics = [#tpu.dimension_semantics<parallel>], iteration_bounds = array<i64: 2>, scalar_prefetch = 0 : i64, scratch_operands = 0 : i64, tpu.core_type = #tpu.core_type<tc>, window_params = [{transform_indices = @transform_0, window_bounds = array<i64: 1, 8, 32>}, {pipeline_mode = #tpu.pipeline_mode<synchronous>, transform_indices = @transform_1, window_bounds = array<i64: 3, 4, 32, 8>}, {pipeline_mode = #tpu.pipeline_mode<synchronous>, transform_indices = @transform_2, window_bounds = array<i64: 3, 4, 1, 8>}, {pipeline_mode = #tpu.pipeline_mode<synchronous>, transform_indices = @transform_3, window_bounds = array<i64: 4, 8, 128>}, {pipeline_mode = #tpu.pipeline_mode<synchronous>, transform_indices = @transform_4, window_bounds = array<i64: 1, 128>}, {transform_indices = @transform_5, window_bounds = array<i64: 1, 8, 128>}]} {
    %c0 = arith.constant 0 : index
    %c0_0 = arith.constant 0 : index
    %c0_1 = arith.constant 0 : index
    %0 = vector.load %arg1[%c0, %c0_0, %c0_1] : memref<1x8x32xf32, #tpu.memory_space<vmem>>, vector<1x8x32xf32>
    %1 = vector.shape_cast %0 : vector<1x8x32xf32> to vector<8x32xf32>
    %2 = vector.shape_cast %1 : vector<8x32xf32> to vector<1x8x32xf32>
    %3 = vector.broadcast %2 : vector<1x8x32xf32> to vector<4x8x32xf32>
    %c0_2 = arith.constant 0 : index
    %c0_3 = arith.constant 0 : index
    %c0_4 = arith.constant 0 : index
    %c0_5 = arith.constant 0 : index
    %4 = vector.load %arg2[%c0_2, %c0_3, %c0_4, %c0_5] : memref<3x4x32x8xf32, #tpu.memory_space<vmem>>, vector<1x4x32x8xf32>
    %5 = vector.shape_cast %4 : vector<1x4x32x8xf32> to vector<4x32x8xf32>
    "tpu.trace_start"() <{level = 10 : i32, message = "hsd,hde->hse"}> : () -> ()
    %cst = arith.constant dense<0.000000e+00> : vector<4x8x8xf32>
    %6 = tpu.matmul %3, %5, %cst {dimension_numbers = #tpu.dot_dimension_numbers<[2], [1], [1], [2], [0, 0, 0, 1, 1, 2], [0], [0]>} : vector<4x8x32xf32>, vector<4x32x8xf32>, vector<4x8x8xf32> -> vector<4x8x8xf32>
    "tpu.trace_stop"() : () -> ()
    %c0_6 = arith.constant 0 : index
    %c0_7 = arith.constant 0 : index
    %c0_8 = arith.constant 0 : index
    %c0_9 = arith.constant 0 : index
    %7 = vector.load %arg3[%c0_6, %c0_7, %c0_8, %c0_9] : memref<3x4x1x8xf32, #tpu.memory_space<vmem>>, vector<1x4x1x8xf32>
    %8 = vector.shape_cast %7 : vector<1x4x1x8xf32> to vector<4x1x8xf32>
    %9 = vector.broadcast %8 : vector<4x1x8xf32> to vector<4x8x8xf32>
    %10 = arith.addf %6, %9 : vector<4x8x8xf32>
    %c1 = arith.constant 1 : index
    %c0_10 = arith.constant 0 : index
    %c0_11 = arith.constant 0 : index
    %c0_12 = arith.constant 0 : index
    %11 = vector.load %arg2[%c1, %c0_10, %c0_11, %c0_12] : memref<3x4x32x8xf32, #tpu.memory_space<vmem>>, vector<1x4x32x8xf32>
    %12 = vector.shape_cast %11 : vector<1x4x32x8xf32> to vector<4x32x8xf32>
    "tpu.trace_start"() <{level = 10 : i32, message = "hsd,hde->hse"}> : () -> ()
    %cst_13 = arith.constant dense<0.000000e+00> : vector<4x8x8xf32>
    %13 = tpu.matmul %3, %12, %cst_13 {dimension_numbers = #tpu.dot_dimension_numbers<[2], [1], [1], [2], [0, 0, 0, 1, 1, 2], [0], [0]>} : vector<4x8x32xf32>, vector<4x32x8xf32>, vector<4x8x8xf32> -> vector<4x8x8xf32>
    "tpu.trace_stop"() : () -> ()
    %c1_14 = arith.constant 1 : index
    %c0_15 = arith.constant 0 : index
    %c0_16 = arith.constant 0 : index
    %c0_17 = arith.constant 0 : index
    %14 = vector.load %arg3[%c1_14, %c0_15, %c0_16, %c0_17] : memref<3x4x1x8xf32, #tpu.memory_space<vmem>>, vector<1x4x1x8xf32>
    %15 = vector.shape_cast %14 : vector<1x4x1x8xf32> to vector<4x1x8xf32>
    %16 = vector.broadcast %15 : vector<4x1x8xf32> to vector<4x8x8xf32>
    %17 = arith.addf %13, %16 : vector<4x8x8xf32>
    %c2 = arith.constant 2 : index
    %c0_18 = arith.constant 0 : index
    %c0_19 = arith.constant 0 : index
    %c0_20 = arith.constant 0 : index
    %18 = vector.load %arg2[%c2, %c0_18, %c0_19, %c0_20] : memref<3x4x32x8xf32, #tpu.memory_space<vmem>>, vector<1x4x32x8xf32>
    %19 = vector.shape_cast %18 : vector<1x4x32x8xf32> to vector<4x32x8xf32>
    "tpu.trace_start"() <{level = 10 : i32, message = "hsd,hde->hse"}> : () -> ()
    %cst_21 = arith.constant dense<0.000000e+00> : vector<4x8x8xf32>
    %20 = tpu.matmul %3, %19, %cst_21 {dimension_numbers = #tpu.dot_dimension_numbers<[2], [1], [1], [2], [0, 0, 0, 1, 1, 2], [0], [0]>} : vector<4x8x32xf32>, vector<4x32x8xf32>, vector<4x8x8xf32> -> vector<4x8x8xf32>
    "tpu.trace_stop"() : () -> ()
    %c2_22 = arith.constant 2 : index
    %c0_23 = arith.constant 0 : index
    %c0_24 = arith.constant 0 : index
    %c0_25 = arith.constant 0 : index
    %21 = vector.load %arg3[%c2_22, %c0_23, %c0_24, %c0_25] : memref<3x4x1x8xf32, #tpu.memory_space<vmem>>, vector<1x4x1x8xf32>
    %22 = vector.shape_cast %21 : vector<1x4x1x8xf32> to vector<4x1x8xf32>
    %23 = vector.broadcast %22 : vector<4x1x8xf32> to vector<4x8x8xf32>
    %24 = arith.addf %20, %23 : vector<4x8x8xf32>
    "tpu.trace_start"() <{level = 10 : i32, message = "hqd,hkd->hqk"}> : () -> ()
    %cst_26 = arith.constant dense<0.000000e+00> : vector<4x8x8xf32>
    %25 = tpu.matmul %10, %17, %cst_26 {dimension_numbers = #tpu.dot_dimension_numbers<[2], [2], [1], [1], [0, 0, 0, 1, 1, 1], [0], [0]>} : vector<4x8x8xf32>, vector<4x8x8xf32>, vector<4x8x8xf32> -> vector<4x8x8xf32>
    "tpu.trace_stop"() : () -> ()
    %cst_27 = arith.constant 0.353553385 : f32
    %26 = vector.broadcast %cst_27 : f32 to vector<4x8x8xf32>
    %27 = arith.mulf %25, %26 : vector<4x8x8xf32>
    %28 = tpu.iota {dimensions = array<i32: 0>} : vector<8x8xi32>
    %29 = tpu.iota {dimensions = array<i32: 1>} : vector<8x8xi32>
    %30 = arith.cmpi sgt, %29, %28 : vector<8x8xi32>
    %cst_28 = arith.constant -1.000000e+09 : f32
    %cst_29 = arith.constant 0.000000e+00 : f32
    %31 = vector.broadcast %cst_28 : f32 to vector<8x8xf32>
    %32 = vector.broadcast %cst_29 : f32 to vector<8x8xf32>
    %33 = arith.select %30, %31, %32 : vector<8x8xi1>, vector<8x8xf32>
    %34 = vector.shape_cast %33 : vector<8x8xf32> to vector<1x8x8xf32>
    %35 = vector.broadcast %34 : vector<1x8x8xf32> to vector<4x8x8xf32>
    %36 = arith.addf %27, %35 : vector<4x8x8xf32>
    %cst_30 = arith.constant dense<0xFF800000> : vector<4x8xf32>
    %37 = vector.multi_reduction <maximumf>, %36, %cst_30 [2] : vector<4x8x8xf32> to vector<4x8xf32>
    %38 = vector.shape_cast %37 : vector<4x8xf32> to vector<4x8x1xf32>
    %39 = vector.broadcast %38 : vector<4x8x1xf32> to vector<4x8x8xf32>
    %40 = arith.subf %36, %39 : vector<4x8x8xf32>
    %41 = math.exp %40 : vector<4x8x8xf32>
    %cst_31 = arith.constant dense<0.000000e+00> : vector<4x8xf32>
    %42 = vector.multi_reduction <add>, %41, %cst_31 [2] : vector<4x8x8xf32> to vector<4x8xf32>
    %43 = vector.shape_cast %42 : vector<4x8xf32> to vector<4x8x1xf32>
    %44 = vector.broadcast %43 : vector<4x8x1xf32> to vector<4x8x8xf32>
    %45 = arith.divf %41, %44 : vector<4x8x8xf32>
    "tpu.trace_start"() <{level = 10 : i32, message = "hqk,hkd->hqd"}> : () -> ()
    %cst_32 = arith.constant dense<0.000000e+00> : vector<4x8x8xf32>
    %46 = tpu.matmul %45, %24, %cst_32 {dimension_numbers = #tpu.dot_dimension_numbers<[2], [1], [1], [2], [0, 0, 0, 1, 1, 2], [0], [0]>} : vector<4x8x8xf32>, vector<4x8x8xf32>, vector<4x8x8xf32> -> vector<4x8x8xf32>
    "tpu.trace_stop"() : () -> ()
    %c0_33 = arith.constant 0 : index
    %c0_34 = arith.constant 0 : index
    %c0_35 = arith.constant 0 : index
    %47 = vector.load %arg4[%c0_33, %c0_34, %c0_35] : memref<4x8x128xf32, #tpu.memory_space<vmem>>, vector<4x8x128xf32>
    "tpu.trace_start"() <{level = 10 : i32, message = "hqd,hdo->hqo"}> : () -> ()
    %cst_36 = arith.constant dense<0.000000e+00> : vector<4x8x128xf32>
    %48 = tpu.matmul %46, %47, %cst_36 {dimension_numbers = #tpu.dot_dimension_numbers<[2], [1], [1], [2], [0, 0, 0, 1, 1, 2], [0], [0]>} : vector<4x8x8xf32>, vector<4x8x128xf32>, vector<4x8x128xf32> -> vector<4x8x128xf32>
    "tpu.trace_stop"() : () -> ()
    %cst_37 = arith.constant dense<0.000000e+00> : vector<8x128xf32>
    %49 = vector.multi_reduction <add>, %48, %cst_37 [0] : vector<4x8x128xf32> to vector<8x128xf32>
    %c0_38 = arith.constant 0 : index
    %c0_39 = arith.constant 0 : index
    %50 = vector.load %arg5[%c0_38, %c0_39] : memref<1x128xf32, #tpu.memory_space<vmem>>, vector<1x128xf32>
    %51 = vector.broadcast %50 : vector<1x128xf32> to vector<8x128xf32>
    %52 = arith.addf %49, %51 : vector<8x128xf32>
    %c0_40 = arith.constant 0 : index
    %c0_41 = arith.constant 0 : index
    %c0_42 = arith.constant 0 : index
    %53 = vector.load %arg6[%c0_40, %c0_41, %c0_42] : memref<1x8x128xf32, #tpu.memory_space<vmem>>, vector<1x8x128xf32>
    %54 = vector.shape_cast %53 : vector<1x8x128xf32> to vector<8x128xf32>
    %55 = vector.shape_cast %52 : vector<8x128xf32> to vector<1x8x128xf32>
    tpu.vector_store %arg6[%c0_40, %c0_41, %c0_42], %55 {strides = array<i32>} : memref<1x8x128xf32, #tpu.memory_space<vmem>>, vector<1x8x128xf32>,
    return
  }
  func.func @transform_0(%arg0: i32) -> (i32, i32, i32) {
    %c0_i32 = arith.constant 0 : i32
    %c0_i32_0 = arith.constant 0 : i32
    %c0_i32_1 = arith.constant 0 : i32
    return %arg0, %c0_i32, %c0_i32_0 : i32, i32, i32
  }
  func.func @transform_1(%arg0: i32) -> (i32, i32, i32, i32) {
    %c0_i32 = arith.constant 0 : i32
    %c0_i32_0 = arith.constant 0 : i32
    %c0_i32_1 = arith.constant 0 : i32
    %c0_i32_2 = arith.constant 0 : i32
    %c0_i32_3 = arith.constant 0 : i32
    return %c0_i32, %c0_i32_0, %c0_i32_1, %c0_i32_2 : i32, i32, i32, i32
  }
  func.func @transform_2(%arg0: i32) -> (i32, i32, i32, i32) {
    %c0_i32 = arith.constant 0 : i32
    %c0_i32_0 = arith.constant 0 : i32
    %c0_i32_1 = arith.constant 0 : i32
    %c0_i32_2 = arith.constant 0 : i32
    %c0_i32_3 = arith.constant 0 : i32
    return %c0_i32, %c0_i32_0, %c0_i32_1, %c0_i32_2 : i32, i32, i32, i32
  }
  func.func @transform_3(%arg0: i32) -> (i32, i32, i32) {
    %c0_i32 = arith.constant 0 : i32
    %c0_i32_0 = arith.constant 0 : i32
    %c0_i32_1 = arith.constant 0 : i32
    %c0_i32_2 = arith.constant 0 : i32
    return %c0_i32, %c0_i32_0, %c0_i32_1 : i32, i32, i32
  }
  func.func @transform_4(%arg0: i32) -> (i32, i32) {
    %c0_i32 = arith.constant 0 : i32
    %c0_i32_0 = arith.constant 0 : i32
    %c0_i32_1 = arith.constant 0 : i32
    return %c0_i32, %c0_i32_0 : i32, i32
  }
  func.func @transform_5(%arg0: i32) -> (i32, i32, i32) {
    %c0_i32 = arith.constant 0 : i32
    %c0_i32_0 = arith.constant 0 : i32
    %c0_i32_1 = arith.constant 0 : i32
    return %arg0, %c0_i32, %c0_i32_0 : i32, i32, i32
  }
}

</mosaic_0001>

<bundles_post_ra>
// kernel: tpu_custom_call.1
= control target key start
LH: loop header
LB: loop body
LE: loop exit
PB: predicated region body
PF: predicated region fallthrough
CT: control target
= control target key end

     0   :  { %10 = vsyncpa [#allocation3], 0  ;;  %s3203_s0 = inlined_call_operand.vmem [shape: f32[2,8,32], index: 0, kind: input, shape index: {}]   ;;  %s3204_s1 = inlined_call_operand.vmem [shape: f32[3,4,32,8], index: 1, kind: input, shape index: {}]   ;;  %s3205_s2 = inlined_call_operand.vmem [shape: f32[3,4,1,8], index: 2, kind: input, shape index: {}]   ;;  %s3206_s3 = inlined_call_operand.vmem [shape: f32[4,8,128], index: 3, kind: input, shape index: {}]   ;;  %s3207_s4 = inlined_call_operand.vmem [shape: f32[1,128], index: 4, kind: input, shape index: {}]   ;;  %s3208_s5 = inlined_call_operand.hbm [shape: f32[2,8,128], index: 5, kind: output, shape index: {}]  }
   0x1   :  { %12 = vsyncpa [#allocation3 + $0x1], 0  ;;  %s2756_s18 = smov 0   ;;  %s2758_s19 = smov 0  }
   0x2   :  { %s2760_s20 = smov 0   ;;  %s2762_s21 = smov 0  }
   0x3 LB: > { %s2777_s22 = sadd.s32 4294967295, %s2721_s21   ;;  %s2237_s23 = sadd.s32 4294967294, %s2721_s21   ;;  %s2721_s21 = sphi %s2762_s21, %s3214_s21   ;;  %s2717_s20 = sphi %s2760_s20, %s3213_s20   ;;  %s2713_s19 = sphi %s2758_s19, %s3212_s19   ;;  %s2709_s18 = sphi %s2756_s18, %s3211_s18  }
   0x4   : > { %s2781_s24 = sadd.s32 1, %s2721_s21   ;;  %s135_s25 = sadd.s32 1, %s2717_s20 }
   0x5   : > { %s132_s26 = ssub.s32 %s2721_s21, %s2781_s24  ;;  %p145_p0 = scmp.ne.s32.totalorder %s2717_s20, %s2713_s19 }
   0x6   : > { %p133_p1 = scmp.eq.s32.totalorder %s132_s26, 0  ;;  %p146_p2 = scmp.eq.s32.totalorder %s2777_s22, 1 }
   0x7   : > { %p151_p3 = scmp.ne.s32.totalorder %s2713_s19, %s2709_s18  ;;  %p152_p4 = scmp.eq.s32.totalorder %s2237_s23, 1 }
   0x8   : > { %s2792_s27 = scalar_select %p133_p1, %s2717_s20, %s135_s25  }
   0x9   : > { %p2794_p5 = por %p146_p2, %p145_p0  ;;  %p2798_p6 = por %p152_p4, %p151_p3 }
   0xa   : > { %p2240_p7 = scmp.ge.s32.totalorder %s2721_s21, 1  ;;  %p189_p8 = scmp.lt.s32.totalorder %s2721_s21, 3 }
   0xc   : > { %p190_p9 = pnand %p2240_p7, %p189_p8 }
   0xd   : > { %p216_p10 = scmp.lt.s32.totalorder (!%p190_p9), %s2777_s22, 1  ;;  %s213_s10 = sand.u32 (!%p190_p9), 1, %s2713_s19  }
   0xe   : > { %193 = sbr.rel (%p190_p9) target bundleno = 1173 (0x495), region = 40  ;;  %s2241_s11 = sshll.u32 (!%p190_p9), %s213_s10, 3 }
   0xf   : > { %s2325_s14 = sshll.u32 (!%p190_p9), %s2777_s22, 7  ;;  %s215_s15 = scalar_lea.vmem (!%p190_p9), [#allocation2], %s2241_s11 }
  0x10   : > { %s2178_s16 = sshll.u32 (!%p190_p9), %s215_s15, 4  ;;  %s2176_s25 = scalar_lea.hbm (!%p190_p9), %s3208_s5, %s2325_s14  ;;  %s2179_s16 = int_to_ptr.vmem [resolvable:$true] %s2178_s16 }
  0x11   : > { %s2165_s26 = scalar_lea.sflag (!%p190_p9), [#allocation3], %s213_s10  ;;  %s2661_s30 = scalar_lea.vmem (!%p190_p9), %s2179_s16, 128 }
  0x12   : > { %p2662_p11 = scmp.ne.s32.totalorder (!%p190_p9), %s2179_s16, %s2661_s30  ;;  %s2725_s6 = smov (!%p190_p9), [#allocation2]  }
  0x13   : > { %v224_v0 = vld [vmem:[%s3204_s1 + $0x18] sm:$0xff]  ;;  %v2723_v2 = vmov 0.0   ;;  %v223_v3 = vld [vmem:[%s3204_s1 + $0x10] sm:$0xff]  ;;  %s217_s13 = scalar_select %p216_p10, %s2777_s22, 1  ;;  %v222_v5 = vld [vmem:[%s3204_s1 + $0x8] sm:$0xff]  ;;  %vm265_vm0 = vcmask 261120  }
  0x14   : > { %v228_v1 = vld [vmem:[%s3204_s1 + $0x38] sm:$0xff]  ;;  %2412 = vmatprep.subr.mxu0 %v2723_v2  ;;  %2423 = vmatprep.subr.mxu1 %v2723_v2  ;;  %v227_v4 = vld [vmem:[%s3204_s1 + $0x30] sm:$0xff]  ;;  %v226_v6 = vld [vmem:[%s3204_s1 + $0x28] sm:$0xff]  ;;  %vm2724_vm1 = vmmov 0   ;;  %vm1201_vm2 = vcmask 64512   ;;  %p2663_p12 = pnand %p2662_p11, %p2794_p5 }
  0x15   : > { %2413 = vmatpush3.msra.mxu0 %v224_v0  ;;  %2424 = vmatpush3.msra.mxu1 %v228_v1  ;;  %s2242_s23 = sshll.u32 %s217_s13, 3  ;;  %v221_v7 = vld [vmem:[%s3204_s1] sm:$0xff]  ;;  %v232_v10 = vld [vmem:[%s3204_s1 + $0x58] sm:$0xff]  ;;  %v231_v12 = vld [vmem:[%s3204_s1 + $0x50] sm:$0xff] }
  0x16   : > { %2414 = vmatprep.subr.mxu0 %v2723_v2  ;;  %2425 = vmatprep.subr.mxu1 %v2723_v2  ;;  %s219_s7 = scalar_lea.vmem %s3203_s0, %s2242_s23  ;;  %v225_v8 = vld [vmem:[%s3204_s1 + $0x20] sm:$0xff]  ;;  %v236_v11 = vld [vmem:[%s3204_s1 + $0x78] sm:$0xff]  ;;  %v235_v13 = vld [vmem:[%s3204_s1 + $0x70] sm:$0xff]  ;;  %p2664_p13 = pneg %p2663_p12 }
  0x17   : > { %2415 = vmatpush3.msra.mxu0 %v223_v3  ;;  %2426 = vmatpush3.msra.mxu1 %v227_v4  ;;  %v2839_v9 = vld [vmem:[%s219_s7] sm:$0xff]  ;;  %v230_v14 = vld [vmem:[%s3204_s1 + $0x48] sm:$0xff]  ;;  %v2254_v18 = vld [vmem:[%s3204_s1 + $0x98] sm:$0xff]  ;;  %s2665_s7 = sshll.u32 %s2725_s6, 4  ;;  %s2666_s7 = int_to_ptr.vmem [resolvable:$false] %s2665_s7 }
  0x18   : > { %2416 = vmatprep.subr.mxu0 %v2723_v2  ;;  %2427 = vmatprep.subr.mxu1 %v2723_v2  ;;  %v234_v15 = vld [vmem:[%s3204_s1 + $0x68] sm:$0xff]  ;;  %v229_v16 = vld [vmem:[%s3204_s1 + $0x40] sm:$0xff]  ;;  %v2258_v19 = vld [vmem:[%s3204_s1 + $0xb8] sm:$0xff]  ;;  %s2667_s22 = scalar_lea.vmem %s2666_s7, 256  ;;  %p2668_p0 = scmp.lt.s32.totalorder %s2179_s16, %s2666_s7 }
  0x19   : > { %2417 = vmatpush3.msra.mxu0 %v222_v5  ;;  %2428 = vmatpush3.msra.mxu1 %v226_v6  ;;  %v233_v17 = vld [vmem:[%s3204_s1 + $0x60] sm:$0xff]  ;;  %v2253_v20 = vld [vmem:[%s3204_s1 + $0x90] sm:$0xff]  ;;  %v2252_v22 = vld [vmem:[%s3204_s1 + $0x88] sm:$0xff]  ;;  %p2669_p1 = scmp.lt.s32.totalorder %s2667_s22, %s2661_s30 }
  0x1a   : > { %2418 = vmatprep.subr.mxu0 %v2723_v2  ;;  %2429 = vmatprep.subr.mxu1 %v2723_v2  ;;  %v2257_v21 = vld [vmem:[%s3204_s1 + $0xb0] sm:$0xff]  ;;  %v2256_v23 = vld [vmem:[%s3204_s1 + $0xa8] sm:$0xff]  ;;  %v2251_v24 = vld [vmem:[%s3204_s1 + $0x80] sm:$0xff] }
  0x1b   : > { %2419 = vmatpush3.msra.mxu0 %v221_v7  ;;  %2420 = vmatprep.mubr.msk.f32.mxu0 %vm2724_vm1, %v2723_v2  ;;  %v2255_v25 = vld [vmem:[%s3204_s1 + $0xa0] sm:$0xff]  ;;  %v2262_v26 = vld [vmem:[%s3204_s1 + $0xd8] sm:$0xff]  ;;  %v2261_v28 = vld [vmem:[%s3204_s1 + $0xd0] sm:$0xff]  ;;  %p2670_p2 = por %p2669_p1, %p2668_p0 }
  0x1c   : > { %2430 = vmatpush3.msra.mxu1 %v225_v8  ;;  %2421 = vmatmul.mubr.msk.f32.vlgmr.msra.gmra.mxu0 %vm265_vm0, %v2839_v9  ;;  %v2266_v27 = vld [vmem:[%s3204_s1 + $0xf8] sm:$0xff]  ;;  %v2265_v29 = vld [vmem:[%s3204_s1 + $0xf0] sm:$0xff]  ;;  %v2260_v30 = vld [vmem:[%s3204_s1 + $0xc8] sm:$0xff] }
  0x1d   : > { %2431 = vmatprep.mubr.msk.f32.mxu1 %vm2724_vm1, %v2723_v2  ;;  %2434 = vmatprep.subr.mxu0 %v2723_v2  ;;  %v2264_v31 = vld [vmem:[%s3204_s1 + $0xe8] sm:$0xff]  ;;  %v2259_v32 = vld [vmem:[%s3204_s1 + $0xc0] sm:$0xff]  ;;  %v2282_v34 = vld [vmem:[%s3204_s1 + $0x118] sm:$0xff]  ;;  %p2671_p3 = pnand %p2670_p2, %p2664_p13 }
  0x1e   : > { %2445 = vmatprep.subr.mxu1 %v2723_v2  ;;  %2432 = vmatmul.mubr.msk.f32.vlgmr.msra.gmra.mxu1 %vm265_vm0, %v2839_v9  ;;  %v2263_v33 = vld [vmem:[%s3204_s1 + $0xe0] sm:$0xff]  ;;  %v2286_v35 = vld [vmem:[%s3204_s1 + $0x138] sm:$0xff]  ;;  %v2281_v36 = vld [vmem:[%s3204_s1 + $0x110] sm:$0xff] }
  0x1f   : > { %2435 = vmatpush3.msra.mxu0 %v232_v10  ;;  %2446 = vmatpush3.msra.mxu1 %v236_v11  ;;  %v2285_v37 = vld [vmem:[%s3204_s1 + $0x130] sm:$0xff]  ;;  %v2280_v38 = vld [vmem:[%s3204_s1 + $0x108] sm:$0xff]  ;;  %v2279_v40 = vld [vmem:[%s3204_s1 + $0x100] sm:$0xff] }
  0x20   : > { %2436 = vmatprep.subr.mxu0 %v2723_v2  ;;  %2447 = vmatprep.subr.mxu1 %v2723_v2  ;;  %v2284_v39 = vld [vmem:[%s3204_s1 + $0x128] sm:$0xff]  ;;  %v2283_v41 = vld [vmem:[%s3204_s1 + $0x120] sm:$0xff]  ;;  %v2290_v42 = vld [vmem:[%s3204_s1 + $0x158] sm:$0xff] }
  0x21   : > { %2437 = vmatpush3.msra.mxu0 %v231_v12  ;;  %2448 = vmatpush3.msra.mxu1 %v235_v13  ;;  %v2294_v43 = vld [vmem:[%s3204_s1 + $0x178] sm:$0xff]  ;;  %v2289_v44 = vld [vmem:[%s3204_s1 + $0x150] sm:$0xff]  ;;  %v2288_v46 = vld [vmem:[%s3204_s1 + $0x148] sm:$0xff] }
  0x22   : > { %2438 = vmatprep.subr.mxu0 %v2723_v2  ;;  %2449 = vmatprep.subr.mxu1 %v2723_v2  ;;  %v2293_v45 = vld [vmem:[%s3204_s1 + $0x170] sm:$0xff]  ;;  %v2292_v47 = vld [vmem:[%s3204_s1 + $0x168] sm:$0xff]  ;;  %v2287_v48 = vld [vmem:[%s3204_s1 + $0x140] sm:$0xff] }
  0x23   : > { %2439 = vmatpush3.msra.mxu0 %v230_v14  ;;  %2450 = vmatpush3.msra.mxu1 %v234_v15  ;;  %v2291_v49 = vld [vmem:[%s3204_s1 + $0x160] sm:$0xff] }
  0x24   : > { %2440 = vmatprep.subr.mxu0 %v2723_v2  ;;  %2451 = vmatprep.subr.mxu1 %v2723_v2  ;;  %v2271_v58 = vld [vmem:[%s3205_s2 + $0x4] ss:$0 sm:$0xff]  ;;  %v2272_v59 = vld [vmem:[%s3205_s2 + $0x5] ss:$0 sm:$0xff]  ;;  %v2243_v62 = vld [vmem:[%s3205_s2] ss:$0 sm:$0xff] }
  0x25   : > { %2441 = vmatpush3.msra.mxu0 %v229_v16  ;;  %2442 = vmatprep.mubr.msk.f32.mxu0 %vm2724_vm1, %v2723_v2  ;;  %v2244_v63 = vld [vmem:[%s3205_s2 + $0x1] ss:$0 sm:$0xff]  ;;  %v2273_v7 = vld [vmem:[%s3205_s2 + $0x6] ss:$0 sm:$0xff]  ;;  %v2274_v8 = vld [vmem:[%s3205_s2 + $0x7] ss:$0 sm:$0xff] }
  0x26   : > { %2452 = vmatpush3.msra.mxu1 %v233_v17  ;;  %2443 = vmatmul.mubr.msk.f32.vlgmr.msra.gmra.mxu0 %vm265_vm0, %v2839_v9  ;;  %v2245_v11 = vld [vmem:[%s3205_s2 + $0x2] ss:$0 sm:$0xff]  ;;  %v2246_v12 = vld [vmem:[%s3205_s2 + $0x3] ss:$0 sm:$0xff] }
  0x27   : > { %2453 = vmatprep.mubr.msk.f32.mxu1 %vm2724_vm1, %v2723_v2  ;;  %2456 = vmatprep.subr.mxu0 %v2723_v2 }
  0x28   : > { %2467 = vmatprep.subr.mxu1 %v2723_v2  ;;  %2454 = vmatmul.mubr.msk.f32.vlgmr.msra.gmra.mxu1 %vm265_vm0, %v2839_v9 }
  0x29   : > { %2457 = vmatpush3.msra.mxu0 %v2254_v18  ;;  %2468 = vmatpush3.msra.mxu1 %v2258_v19  ;;  %v2299_v19 = vld [vmem:[%s3205_s2 + $0x8] ss:$0 sm:$0xff] }
  0x2a   : > { %2458 = vmatprep.subr.mxu0 %v2723_v2  ;;  %2469 = vmatprep.subr.mxu1 %v2723_v2 }
  0x2b   : > { %2459 = vmatpush3.msra.mxu0 %v2253_v20  ;;  %2470 = vmatpush3.msra.mxu1 %v2257_v21  ;;  %v2300_v20 = vld [vmem:[%s3205_s2 + $0x9] ss:$0 sm:$0xff] }
  0x2c   : > { %2460 = vmatprep.subr.mxu0 %v2723_v2  ;;  %2471 = vmatprep.subr.mxu1 %v2723_v2 }
  0x2d   : > { %2461 = vmatpush3.msra.mxu0 %v2252_v22  ;;  %2472 = vmatpush3.msra.mxu1 %v2256_v23 }
  0x2e   : > { %2462 = vmatprep.subr.mxu0 %v2723_v2  ;;  %2473 = vmatprep.subr.mxu1 %v2723_v2 }
  0x2f   : > { %2463 = vmatpush3.msra.mxu0 %v2251_v24  ;;  %2464 = vmatprep.mubr.msk.f32.mxu0 %vm2724_vm1, %v2723_v2 }
  0x30   : > { %2474 = vmatpush3.msra.mxu1 %v2255_v25  ;;  %2475 = vmatprep.mubr.msk.f32.mxu1 %vm2724_vm1, %v2723_v2 }
  0x31   : > { %2465 = vmatmul.mubr.msk.f32.vlgmr.msra.gmra.mxu0 %vm265_vm0, %v2839_v9  ;;  %2476 = vmatmul.mubr.msk.f32.vlgmr.msra.gmra.mxu1 %vm265_vm0, %v2839_v9 }
  0x32   : > { %2478 = vmatprep.subr.mxu0 %v2723_v2  ;;  %2489 = vmatprep.subr.mxu1 %v2723_v2 }
  0x33   : > { %2479 = vmatpush3.msra.mxu0 %v2262_v26  ;;  %2490 = vmatpush3.msra.mxu1 %v2266_v27 }
  0x34   : > { %2480 = vmatprep.subr.mxu0 %v2723_v2  ;;  %2491 = vmatprep.subr.mxu1 %v2723_v2 }
  0x35   : > { %2481 = vmatpush3.msra.mxu0 %v2261_v28  ;;  %2492 = vmatpush3.msra.mxu1 %v2265_v29 }
  0x36   : > { %2482 = vmatprep.subr.mxu0 %v2723_v2  ;;  %2493 = vmatprep.subr.mxu1 %v2723_v2 }
  0x37   : > { %2483 = vmatpush3.msra.mxu0 %v2260_v30  ;;  %2494 = vmatpush3.msra.mxu1 %v2264_v31  ;;  %v1510_v31 = vlaneseq }
  0x38   : > { %2484 = vmatprep.subr.mxu0 %v2723_v2  ;;  %2495 = vmatprep.subr.mxu1 %v2723_v2 }
  0x39   : > { %2485 = vmatpush3.msra.mxu0 %v2259_v32  ;;  %2486 = vmatprep.mubr.msk.f32.mxu0 %vm2724_vm1, %v2723_v2  ;;  %v1511_v32 = vshrl.u32 %v1510_v31, 7 }
  0x3a   : > { %2496 = vmatpush3.msra.mxu1 %v2263_v33  ;;  %2497 = vmatprep.mubr.msk.f32.mxu1 %vm2724_vm1, %v2723_v2  ;;  %v1513_v33 = vand.u32 127, %v1510_v31 }
  0x3b   : > { %2487 = vmatmul.mubr.msk.f32.vlgmr.msra.gmra.mxu0 %vm265_vm0, %v2839_v9  ;;  %2498 = vmatmul.mubr.msk.f32.vlgmr.msra.gmra.mxu1 %vm265_vm0, %v2839_v9 }
  0x3c   : > { %2500 = vmatprep.subr.mxu0 %v2723_v2  ;;  %2511 = vmatprep.subr.mxu1 %v2723_v2  ;;  %vm1514_vm3 = vcmp.gt.s32.totalorder %v1513_v33, %v1511_v32  ;;  %v1859_v33 = vld [vmem:[%s3206_s3 + $0x18] sm:$0xff] }
  0x3d   : > { %2508 = vmatprep.mubr.msk.f32.mxu0 %vm2724_vm1, %v2723_v2  ;;  %2519 = vmatprep.mubr.msk.f32.mxu1 %vm2724_vm1, %v2723_v2 }
  0x3e   : > { %2501 = vmatpush3.msra.mxu0 %v2282_v34  ;;  %2512 = vmatpush3.msra.mxu1 %v2286_v35 }
  0x3f   : > { %2502 = vmatprep.subr.mxu0 %v2723_v2  ;;  %2513 = vmatprep.subr.mxu1 %v2723_v2 }
  0x40   : > { %2503 = vmatpush3.msra.mxu0 %v2281_v36  ;;  %2514 = vmatpush3.msra.mxu1 %v2285_v37  ;;  %v1515_v36 = vsel %vm1514_vm3, -1e+09, %v2723_v2 }
  0x41   : > { %2504 = vmatprep.subr.mxu0 %v2723_v2  ;;  %2515 = vmatprep.subr.mxu1 %v2723_v2 }
  0x42   : > { %2505 = vmatpush3.msra.mxu0 %v2280_v38  ;;  %2516 = vmatpush3.msra.mxu1 %v2284_v39 }
  0x43   : > { %2506 = vmatprep.subr.mxu0 %v2723_v2  ;;  %2517 = vmatprep.subr.mxu1 %v2723_v2 }
  0x44   : > { %2507 = vmatpush3.msra.mxu0 %v2279_v40  ;;  %2518 = vmatpush3.msra.mxu1 %v2283_v41 }
  0x45   : > { %2522 = vmatprep.subr.mxu0 %v2723_v2  ;;  %2533 = vmatprep.subr.mxu1 %v2723_v2 }
  0x46   : > { %2509 = vmatmul.mubr.msk.f32.vlgmr.msra.gmra.mxu0 %vm265_vm0, %v2839_v9  ;;  %2520 = vmatmul.mubr.msk.f32.vlgmr.msra.gmra.mxu1 %vm265_vm0, %v2839_v9 }
  0x47   : > { %2523 = vmatpush3.msra.mxu0 %v2290_v42  ;;  %2534 = vmatpush3.msra.mxu1 %v2294_v43 }
  0x48   : > { %2524 = vmatprep.subr.mxu0 %v2723_v2  ;;  %2535 = vmatprep.subr.mxu1 %v2723_v2 }
  0x49   : > { %2525 = vmatpush3.msra.mxu0 %v2289_v44  ;;  %2536 = vmatpush3.msra.mxu1 %v2293_v45 }
  0x4a   : > { %2526 = vmatprep.subr.mxu0 %v2723_v2  ;;  %2537 = vmatprep.subr.mxu1 %v2723_v2 }
  0x4b   : > { %2527 = vmatpush3.msra.mxu0 %v2288_v46  ;;  %2538 = vmatpush3.msra.mxu1 %v2292_v47 }
  0x4c   : > { %2528 = vmatprep.subr.mxu0 %v2723_v2  ;;  %2539 = vmatprep.subr.mxu1 %v2723_v2 }
  0x4d   : > { %2530 = vmatprep.mubr.msk.f32.mxu0 %vm2724_vm1, %v2723_v2  ;;  %2541 = vmatprep.mubr.msk.f32.mxu1 %vm2724_vm1, %v2723_v2 }
  0x4e   : > { %2529 = vmatpush3.msra.mxu0 %v2287_v48  ;;  %2540 = vmatpush3.msra.mxu1 %v2291_v49 }
  0x4f   : > { %2531 = vmatmul.mubr.msk.f32.vlgmr.msra.gmra.mxu0 %vm265_vm0, %v2839_v9  ;;  %2542 = vmatmul.mubr.msk.f32.vlgmr.msra.gmra.mxu1 %vm265_vm0, %v2839_v9 }
  0x50   : > { %2544 = vmatprep.subr.mxu0 %v2723_v2  ;;  %2549 = vmatprep.subr.mxu1 %v2723_v2 }
  0x51   : > { %2546 = vmatprep.mubr.msk.f32.mxu0 %vm2724_vm1, %v2723_v2  ;;  %2551 = vmatprep.mubr.msk.f32.mxu1 %vm2724_vm1, %v2723_v2 }
  0xdc   : > { %v335_v50 = vpop.f32.mrf.mxu0 }
  0xdd   : > { %v336_v5 = vadd.f32 %v2243_v62, %v335_v50 }
  0xde   : > { %v2422_v51 = vpop.f32.mrf.mxu0  ;;  %v405_v52 = vpop.f32.mrf.mxu1 }
  0xdf   : > { %v406_v6 = vadd.f32 %v2244_v63, %v405_v52 }
  0xe0   : > { %v2433_v53 = vpop.f32.mrf.mxu1 }
  0xe6   : > { %v475_v54 = vpop.f32.mrf.mxu0 }
  0xe7   : > { %v476_v17 = vadd.f32 %v2245_v11, %v475_v54 }
  0xe8   : > { %v2444_v55 = vpop.f32.mrf.mxu0  ;;  %v545_v56 = vpop.f32.mrf.mxu1 }
  0xe9   : > { %v546_v18 = vadd.f32 %v2246_v12, %v545_v56 }
  0xea   : > { %v2455_v57 = vpop.f32.mrf.mxu1 }
  0xf1   : > { %v661_v60 = vpop.f32.mrf.mxu0  ;;  %v731_v61 = vpop.f32.mrf.mxu1 }
  0xf2   : > { %v662_v0 = vadd.f32 %v2271_v58, %v661_v60  ;;  %v732_v1 = vadd.f32 %v2272_v59, %v731_v61 }
  0xf3   : > { %v2466_v3 = vpop.f32.mrf.mxu0  ;;  %v2477_v4 = vpop.f32.mrf.mxu1 }
  0xf4   : > { %2545 = vmatpush3.xpose.msk.msra.mxu0 %vm1201_vm2, %v662_v0  ;;  %2550 = vmatpush3.xpose.msk.msra.mxu1 %vm1201_vm2, %v732_v1 }
  0xf5   : > { %2554 = vmatprep.subr.mxu0 %v2723_v2  ;;  %2559 = vmatprep.subr.mxu1 %v2723_v2 }
  0xf7   : > { %2547 = vmatmul.mubr.msk.f32.vlgmr.msra.gmra.mxu0 %vm1201_vm2, %v336_v5  ;;  %2552 = vmatmul.mubr.msk.f32.vlgmr.msra.gmra.mxu1 %vm1201_vm2, %v406_v6 }
  0xf8   : > { %2556 = vmatprep.mubr.msk.f32.mxu0 %vm2724_vm1, %v2723_v2  ;;  %2561 = vmatprep.mubr.msk.f32.mxu1 %vm2724_vm1, %v2723_v2 }
  0xfb   : > { %v801_v9 = vpop.f32.mrf.mxu0  ;;  %v871_v10 = vpop.f32.mrf.mxu1 }
  0xfc   : > { %v802_v13 = vadd.f32 %v2273_v7, %v801_v9  ;;  %v872_v14 = vadd.f32 %v2274_v8, %v871_v10 }
  0xfd   : > { %v2488_v15 = vpop.f32.mrf.mxu0  ;;  %v2499_v16 = vpop.f32.mrf.mxu1 }
  0xfe   : > { %2555 = vmatpush3.xpose.msk.msra.mxu0 %vm1201_vm2, %v802_v13  ;;  %2560 = vmatpush3.xpose.msk.msra.mxu1 %vm1201_vm2, %v872_v14  ;;  %v2301_v15 = vld [vmem:[%s3205_s2 + $0xa] ss:$0 sm:$0xff] }
  0xff   : > { %2564 = vmatprep.subr.mxu0 %v2723_v2  ;;  %2569 = vmatprep.subr.mxu1 %v2723_v2 }
 0x101   : > { %2557 = vmatmul.mubr.msk.f32.vlgmr.msra.gmra.mxu0 %vm1201_vm2, %v476_v17  ;;  %2562 = vmatmul.mubr.msk.f32.vlgmr.msra.gmra.mxu1 %vm1201_vm2, %v546_v18 }
 0x102   : > { %2566 = vmatprep.mubr.msk.f32.mxu0 %vm2724_vm1, %v2723_v2  ;;  %2571 = vmatprep.mubr.msk.f32.mxu1 %vm2724_vm1, %v2723_v2 }
 0x106   : > { %v987_v21 = vpop.f32.mrf.mxu0  ;;  %v1057_v22 = vpop.f32.mrf.mxu1 }
 0x107   : > { %v988_v23 = vadd.f32 %v2299_v19, %v987_v21  ;;  %v1058_v24 = vadd.f32 %v2300_v20, %v1057_v22  ;;  %v2302_v20 = vld [vmem:[%s3205_s2 + $0xb] ss:$0 sm:$0xff] }
 0x108   : > { %v2510_v25 = vpop.f32.mrf.mxu0  ;;  %v2521_v26 = vpop.f32.mrf.mxu1 }
 0x109   : > { %2565 = vmatpush3.msra.mxu0 %v988_v23  ;;  %2570 = vmatpush3.msra.mxu1 %v1058_v24 }
 0x10a   : > { %2574 = vmatprep.subr.mxu0 %v2723_v2  ;;  %2579 = vmatprep.subr.mxu1 %v2723_v2 }
 0x10f   : > { %v3109_v27 = vpop.f32.mrf.mxu0  ;;  %v3111_v28 = vpop.f32.mrf.mxu1 }
 0x110   : > { %v1128_v19 = vadd.f32 %v2301_v15, %v3109_v27  ;;  %v1198_v23 = vadd.f32 %v2302_v20, %v3111_v28  ;;  %v1856_v28 = vld [vmem:[%s3206_s3] sm:$0xff] }
 0x111   : > { %v2532_v29 = vpop.f32.mrf.mxu0  ;;  %v2543_v30 = vpop.f32.mrf.mxu1 }
 0x112   : > { %v1857_v29 = vld [vmem:[%s3206_s3 + $0x8] sm:$0xff]  ;;  %v1858_v30 = vld [vmem:[%s3206_s3 + $0x10] sm:$0xff] }
 0x1b7   : > { %v1274_v34 = vpop.f32.mrf.mxu0  ;;  %v1350_v35 = vpop.f32.mrf.mxu1 }
 0x1b8   : > { %v1506_v37 = vmul.f32 0.35355338, %v1274_v34  ;;  %v1507_v38 = vmul.f32 0.35355338, %v1350_v35 }
 0x1b9   : > { %v2548_v39 = vpop.f32.mrf.mxu0  ;;  %v2553_v40 = vpop.f32.mrf.mxu1 }
 0x1ba   : > { %v1516_v41 = vadd.f32 %v1515_v36, %v1506_v37  ;;  %v1517_v43 = vadd.f32 %v1515_v36, %v1507_v38 }
 0x1bc   : > { %v1520_v42 = vsel %vm1201_vm2, %v1516_v41, -inf  ;;  %v1523_v44 = vsel %vm1201_vm2, %v1517_v43, -inf }
 0x1bd   : > { %1521 = vmax.xlane.f32.xlu0 %v1520_v42 }
 0x1c1   : > { %v1426_v45 = vpop.f32.mrf.mxu0  ;;  %v1502_v46 = vpop.f32.mrf.mxu1  ;;  %1524 = vmax.xlane.f32.xlu0 %v1523_v44 }
 0x1c2   : > { %v1508_v47 = vmul.f32 0.35355338, %v1426_v45  ;;  %v1509_v48 = vmul.f32 0.35355338, %v1502_v46 }
 0x1c3   : > { %v2563_v49 = vpop.f32.mrf.mxu1  ;;  %v2558_v50 = vpop.f32.mrf.mxu0 }
 0x1c4   : > { %v1518_v51 = vadd.f32 %v1515_v36, %v1508_v47  ;;  %v1519_v53 = vadd.f32 %v1515_v36, %v1509_v48  ;;  %v2323_v48 = vld [vmem:[%s3207_s4] ss:$0 sm:$0xff] }
 0x1c6   : > { %v1526_v52 = vsel %vm1201_vm2, %v1518_v51, -inf  ;;  %v1529_v54 = vsel %vm1201_vm2, %v1519_v53, -inf }
 0x1c7   : > { %1527 = vmax.xlane.f32.xlu1 %v1526_v52 }
 0x1cb   : > { %1530 = vmax.xlane.f32.xlu1 %v1529_v54 }
 0x246   : > { %v1522_v55 = vpop.xlane.xlu0 %1521 }
 0x247   : > { %v1532_v56 = vsub.f32 %v1516_v41, %v1522_v55 }
 0x249   : > { %v1536_v57 = vmul.f32 1.442695, %v1532_v56 }
 0x24a   : > { %v1525_v58 = vpop.xlane.xlu0 %1524 }
 0x24b   : > { %2645 = vpow2.f32 %v1536_v57  ;;  %v1533_v59 = vsub.f32 %v1517_v43, %v1525_v58 }
 0x24d   : > { %v1538_v60 = vmul.f32 1.442695, %v1533_v59 }
 0x24f   : > { %2647 = vpow2.f32 %v1538_v60 }
 0x250   : > { %v1528_v61 = vpop.xlane.xlu1 %1527 }
 0x251   : > { %v1534_v62 = vsub.f32 %v1518_v51, %v1528_v61 }
 0x253   : > { %v1540_v63 = vmul.f32 1.442695, %v1534_v62 }
 0x254   : > { %v1531_v0 = vpop.xlane.xlu1 %1530 }
 0x255   : > { %2649 = vpow2.f32 %v1540_v63  ;;  %v1535_v1 = vsub.f32 %v1519_v53, %v1531_v0 }
 0x257   : > { %v1542_v3 = vmul.f32 1.442695, %v1535_v1 }
 0x258   : > { %v2646_v4 = vpop.eup %2645 }
 0x259   : > { %2651 = vpow2.f32 %v1542_v3  ;;  %v1544_v5 = vsel %vm1201_vm2, %v2646_v4, 0.0 }
 0x25a   : > { %1545 = vadd.xlane.f32.xlu0 %v1544_v5 }
 0x25c   : > { %v2648_v6 = vpop.eup %2647 }
 0x25d   : > { %v1547_v7 = vsel %vm1201_vm2, %v2648_v6, 0.0 }
 0x25e   : > { %1548 = vadd.xlane.f32.xlu1 %v1547_v7 }
 0x262   : > { %v2650_v8 = vpop.eup %2649 }
 0x263   : > { %v1550_v9 = vsel %vm1201_vm2, %v2650_v8, 0.0 }
 0x264   : > { %1551 = vadd.xlane.f32.xlu0 %v1550_v9 }
 0x266   : > { %v2652_v10 = vpop.eup %2651 }
 0x267   : > { %v1553_v11 = vsel %vm1201_vm2, %v2652_v10, 0.0 }
 0x268   : > { %1554 = vadd.xlane.f32.xlu1 %v1553_v11 }
 0x2e3   : > { %v1546_v12 = vpop.xlane.xlu0 %1545 }
 0x2e4   : > { %2653 = vrcp.f32 %v1546_v12 }
 0x2e7   : > { %v1549_v13 = vpop.xlane.xlu1 %1548 }
 0x2e8   : > { %2655 = vrcp.f32 %v1549_v13 }
 0x2ed   : > { %v1552_v14 = vpop.xlane.xlu0 %1551 }
 0x2ee   : > { %2657 = vrcp.f32 %v1552_v14 }
 0x2f1   : > { %v2654_v16 = vpop.eup %2653  ;;  %v1555_v17 = vpop.xlane.xlu1 %1554 }
 0x2f2   : > { %2659 = vrcp.f32 %v1555_v17  ;;  %v1557_v18 = vmul.f32 %v2654_v16, %v2646_v4 }
 0x2f4   : > { %2567 = vmatmul.mubr.msk.f32.vlgmr.msra.gmra.mxu0 %vm1201_vm2, %v1557_v18 }
 0x2f5   : > { %v2656_v21 = vpop.eup %2655  ;;  %2575 = vmatpush3.msra.mxu0 %v1128_v19  ;;  %2576 = vmatprep.mubr.msk.f32.mxu0 %vm2724_vm1, %v2723_v2 }
 0x2f6   : > { %v1559_v22 = vmul.f32 %v2656_v21, %v2648_v6  ;;  %2584 = vmatprep.subr.mxu0 %v2723_v2 }
 0x2f8   : > { %2572 = vmatmul.mubr.msk.f32.vlgmr.msra.gmra.mxu1 %vm1201_vm2, %v1559_v22 }
 0x2f9   : > { %2580 = vmatpush3.msra.mxu1 %v1198_v23  ;;  %2581 = vmatprep.mubr.msk.f32.mxu1 %vm2724_vm1, %v2723_v2 }
 0x2fa   : > { %2589 = vmatprep.subr.mxu1 %v2723_v2 }
 0x2fb   : > { %v2658_v24 = vpop.eup %2657 }
 0x2fc   : > { %v1561_v25 = vmul.f32 %v2658_v24, %v2650_v8 }
 0x2fe   : > { %2577 = vmatmul.mubr.msk.f32.vlgmr.msra.gmra.mxu0 %vm1201_vm2, %v1561_v25 }
 0x2ff   : > { %v2660_v26 = vpop.eup %2659  ;;  %2586 = vmatprep.mubr.msk.f32.mxu0 %vm2724_vm1, %v2723_v2  ;;  %2585 = vmatpush3.msra.mxu0 %v1856_v28 }
 0x300   : > { %v1563_v27 = vmul.f32 %v2660_v26, %v2652_v10  ;;  %2594 = vmatprep.subr.mxu0 %v2723_v2 }
 0x302   : > { %2582 = vmatmul.mubr.msk.f32.vlgmr.msra.gmra.mxu1 %vm1201_vm2, %v1563_v27 }
 0x303   : > { %2591 = vmatprep.mubr.msk.f32.mxu1 %vm2724_vm1, %v2723_v2  ;;  %2590 = vmatpush3.msra.mxu1 %v1857_v29 }
 0x304   : > { %2599 = vmatprep.subr.mxu1 %v2723_v2 }
 0x3b4   : > { %v1633_v31 = vpop.f32.mrf.mxu0 }
 0x3b5   : > { %2587 = vmatmul.mubr.msk.f32.vlgmr.msra.gmra.mxu0 %vm1201_vm2, %v1633_v31 }
 0x3b6   : > { %v2568_v32 = vpop.f32.mrf.mxu0  ;;  %2595 = vmatpush3.msra.mxu0 %v1858_v30  ;;  %2596 = vmatprep.mubr.msk.f32.mxu0 %vm2724_vm1, %v2723_v2 }
 0x3b8   : > { %v1706_v34 = vpop.f32.mrf.mxu1 }
 0x3b9   : > { %2592 = vmatmul.mubr.msk.f32.vlgmr.msra.gmra.mxu1 %vm1201_vm2, %v1706_v34 }
 0x3ba   : > { %v2573_v35 = vpop.f32.mrf.mxu1  ;;  %2600 = vmatpush3.msra.mxu1 %v1859_v33  ;;  %2601 = vmatprep.mubr.msk.f32.mxu1 %vm2724_vm1, %v2723_v2 }
 0x3be   : > { %v1779_v36 = vpop.f32.mrf.mxu0 }
 0x3bf   : > { %2597 = vmatmul.mubr.msk.f32.vlgmr.msra.gmra.mxu0 %vm1201_vm2, %v1779_v36 }
 0x3c0   : > { %v2578_v37 = vpop.f32.mrf.mxu0 }
 0x3c2   : > { %v1852_v38 = vpop.f32.mrf.mxu1 }
 0x3c3   : > { %2602 = vmatmul.mubr.msk.f32.vlgmr.msra.gmra.mxu1 %vm1201_vm2, %v1852_v38 }
 0x3c4   : > { %v2583_v39 = vpop.f32.mrf.mxu1 }
 0x475   : > { %v1929_v40 = vpop.f32.mrf.mxu0 }
 0x477   : > { %v2588_v41 = vpop.f32.mrf.mxu0 }
 0x479   : > { %v2002_v42 = vpop.f32.mrf.mxu1 }
 0x47a   : > { %v2152_v45 = vadd.f32 %v2002_v42, %v1929_v40 }
 0x47b   : > { %v2593_v43 = vpop.f32.mrf.mxu1 }
 0x47f   : > { %v2075_v44 = vpop.f32.mrf.mxu0 }
 0x480   : > { %v2153_v2 = vadd.f32 %v2152_v45, %v2075_v44 }
 0x481   : > { %v2598_v46 = vpop.f32.mrf.mxu0 }
 0x483   : > { %v2148_v47 = vpop.f32.mrf.mxu1 }
 0x484   : > { %v2154_v49 = vadd.f32 %v2153_v2, %v2148_v47 }
 0x485   : > { %v2603_v50 = vpop.f32.mrf.mxu1 }
 0x486   : > { %v2162_v51 = vadd.f32 %v2323_v48, %v2154_v49 }
 0x488   : > { %2163 = vst [vmem:[%s215_s15] sm:$0xff] %v2162_v51 }
 0x489   : > { %2674 = shalt.err (!%p2671_p3)
}
 0x48a   : > { %s2675_s8 = scalar_lea.hbm %s2176_s25, 128  ;;  %s2679_s11 = scalar_lea.hbm %s3208_s5, 256 }
 0x48b   : > { %p2676_p4 = scmp.ne.s32.totalorder %s2176_s25, %s2675_s8  ;;  %p2680_p9 = scmp.lt.s32.totalorder %s2176_s25, %s3208_s5 }
 0x48c   : > { %p2681_p10 = scmp.lt.s32.totalorder %s2679_s11, %s2675_s8 }
 0x48d   : > { %p2677_p7 = pnand %p2676_p4, %p2794_p5 }
 0x48e   : > { %p2682_p11 = por %p2681_p10, %p2680_p9 }
 0x48f   : > { %p2678_p8 = pneg %p2677_p7 }
 0x491   : > { %p2683_p12 = pnand %p2682_p11, %p2678_p8 }
 0x493   : > { %2686 = shalt.err (!%p2683_p12)
}
 0x494   : > { %2604 = dma.vmem_to_hbm [thread:$0]  (%p2794_p5), %s2179_s16, 128, %s2176_s25, %s2165_s26  }
 0x495 PF: > { %p2610_p13 = scmp.ge.s32.totalorder %s2721_s21, 2  ;;  %s2190_s14 = sand.u32 1, %s2709_s18  }
 0x496   : > { %s2191_s15 = scalar_lea.sflag [#allocation3], %s2190_s14 }
 0x497   : > { %p2607_p0 = pnand %p2610_p13, %p2798_p6 }
 0x499   : > { %p2608_p1 = pneg %p2607_p0 }
 0x49b   : > { %2704 = dma.done.wait (%p2608_p1), %s2191_s15, 128  }
 0x49c   : > { %2706 = vsyncadd (%p2608_p1), %s2191_s15, 4294967168  ;;  %p15_p2 = scmp.ge.s32.totalorder %s2781_s24, 4   ;;  %s3211_s18 = smov %s2713_s19 }
 0x49d   : > { %s3212_s19 = smov %s2717_s20  ;;  %s3213_s20 = smov %s2792_s27 }
 0x49e   : > { %s3214_s21 = smov %s2781_s24  ;;  %17 = sbr.rel (!%p15_p2) target bundleno = 3 (0x3), region = 79 }
 0x4a3   :  { %2196 = vsyncpa [#allocation3], 1 }
 0x4a4   :  { %2198 = vsyncpa [#allocation3 + $0x1], 1 }

</bundles_post_ra>
